<compile_context>
chip_gen: v7x
topology: tpu7x:2x2x1
jax: 0.10.0
libtpu: 0.0.40
codegen_flags: <defaults>
</compile_context>

<pallas_src>
import functools

import jax
import jax.numpy as jnp
from jax.experimental import pallas as pl
from jax.experimental.pallas import tpu as pltpu


# ----------------------------------------------------------------------------
# Architecture construction (mirrors the PyTorch __init__ logic exactly)
# ----------------------------------------------------------------------------
def encoder_dims(input_dim, latent_dim):
    dim_list = [latent_dim]
    while 2 * dim_list[-1] < input_dim:
        dim_list.append(2 * dim_list[-1])
    dim_list.append(input_dim)
    dim_list.reverse()
    return dim_list  # e.g. [64, 32, 16, 8]


def decoder_dims(latent_dim, input_dim):
    dim_list = [latent_dim]
    while 2 * dim_list[-1] < input_dim:
        dim_list.append(2 * dim_list[-1])
    dim_list.append(input_dim)
    return dim_list  # e.g. [8, 16, 32, 64]


def build_layer_specs(input_dim, latent_dim):
    """Returns list of (in_dim, out_dim, apply_relu) for the full autoencoder."""
    specs = []
    for dims in (encoder_dims(input_dim, latent_dim),
                 decoder_dims(latent_dim, input_dim)):
        n = len(dims) - 1
        for i in range(n):
            specs.append((dims[i], dims[i + 1], i < n - 1))
    return specs


def init_params(key, layer_specs):
    """PyTorch-Linear-style init: U(-1/sqrt(fan_in), +1/sqrt(fan_in)).

    Weights are kept in PyTorch's native (out, in) layout since the kernel
    computes h_new = W @ h on feature-major (D, B) activations.
    Biases are stored as (out, 1) f32 columns for lane-broadcast.
    """
    weights, biases = [], []
    for (din, dout, _) in layer_specs:
        key, kw, kb = jax.random.split(key, 3)
        bound = 1.0 / jnp.sqrt(jnp.float32(din))
        w = jax.random.uniform(kw, (dout, din), jnp.float32, -bound, bound)
        b = jax.random.uniform(kb, (dout, 1), jnp.float32, -bound, bound)
        weights.append(w)
        biases.append(b)
    return weights, biases


def _round_up(x, m):
    return ((x + m - 1) // m) * m


# ----------------------------------------------------------------------------
# Pallas kernel: fused MLP chain on a (D, TB) lane-dense batch tile
# ----------------------------------------------------------------------------
def make_autoencoder_kernel(relu_flags):
    n_layers = len(relu_flags)

    def kernel(x_ref, *refs):
        w_refs = refs[:n_layers]                 # bf16, (dout, din)
        b_refs = refs[n_layers:2 * n_layers]     # f32,  (dout, 1)
        out_ref = refs[2 * n_layers]             # f32,  (D, TB)

        h = x_ref[...]                           # bf16, (D, TB)
        for i in range(n_layers):
            # MXU matmul with bf16 operands, f32 accumulation.
            acc = jnp.dot(w_refs[i][...], h,
                          preferred_element_type=jnp.float32)
            acc = acc + b_refs[i][...]           # f32 epilogue
            if relu_flags[i]:
                acc = jnp.maximum(acc, 0.0)
            # Cast down once per layer to feed the next bf16 matmul.
            h = acc.astype(jnp.bfloat16) if i < n_layers - 1 else acc
        out_ref[...] = h.astype(out_ref.dtype)

    return kernel


def autoencoder_forward(x, weights, biases, relu_flags, *, max_tb=2048):
    """x: (B, D) f32.  weights[i]: (dout, din) f32.  biases[i]: (dout, 1) f32."""
    B, D = x.shape
    n_layers = len(weights)

    # Batch tile on the lane axis: multiple of 128, capped at max_tb lanes.
    TB = min(max_tb, _round_up(B, 128))
    Bp = _round_up(B, TB)
    grid = (Bp // TB,)

    # Feature-major, bf16 activations; pad batch (lane axis) to Bp.
    xt = x.T.astype(jnp.bfloat16)                # (D, B)
    if Bp > B:
        xt = jnp.pad(xt, ((0, 0), (0, Bp - B)))

    weights_bf16 = [w.astype(jnp.bfloat16) for w in weights]

    # Batch tile moves with the grid; weights/biases are VMEM-resident.
    in_specs = [pl.BlockSpec((D, TB), lambda i: (0, i))]
    in_specs += [pl.BlockSpec(w.shape, lambda i: (0, 0)) for w in weights_bf16]
    in_specs += [pl.BlockSpec(b.shape, lambda i: (0, 0)) for b in biases]
    out_specs = pl.BlockSpec((D, TB), lambda i: (0, i))

    flops = 2 * Bp * sum(int(w.shape[0]) * int(w.shape[1]) for w in weights)
    bytes_accessed = (D * Bp * 2                      # bf16 input tile stream
                      + D * Bp * 4                    # f32 output stream
                      + sum(w.size * 2 for w in weights_bf16)
                      + sum(b.size * 4 for b in biases))

    out_t = pl.pallas_call(
        make_autoencoder_kernel(tuple(relu_flags)),
        out_shape=jax.ShapeDtypeStruct((D, Bp), jnp.float32),
        grid=grid,
        in_specs=in_specs,
        out_specs=out_specs,
        compiler_params=pltpu.CompilerParams(
            dimension_semantics=("parallel",)),
        cost_estimate=pl.CostEstimate(
            flops=flops, transcendentals=0, bytes_accessed=bytes_accessed),
    )(xt, *weights_bf16, *biases)

    return out_t[:, :B].T                            # back to (B, D) f32


# ----------------------------------------------------------------------------
# Pure-JAX reference (emulates the kernel's bf16-operand / f32-accumulate path)
# ----------------------------------------------------------------------------
def reference_forward(x, weights, biases, relu_flags):
    n = len(weights)
    h = x.astype(jnp.bfloat16)
    for i, (w, b, r) in enumerate(zip(weights, biases, relu_flags)):
        acc = jnp.dot(h, w.astype(jnp.bfloat16).T,
                      preferred_element_type=jnp.float32) + b.T
        if r:
            acc = jnp.maximum(acc, 0.0)
        h = acc.astype(jnp.bfloat16) if i < n - 1 else acc
    return h.astype(jnp.float32)


if __name__ == "__main__":
    # Autoencoder(input_dim=64, latent_dim=8); forward on x of shape (batch, 64).
    input_dim = 64
    latent_dim = 8

    layer_specs = build_layer_specs(input_dim, latent_dim)
    relu_flags = [r for (_, _, r) in layer_specs]

    key = jax.random.PRNGKey(0)
    key, kx = jax.random.split(key)
    weights, biases = init_params(key, layer_specs)

    fwd = jax.jit(functools.partial(autoencoder_forward,
                                    weights=weights, biases=biases,
                                    relu_flags=relu_flags))

    # Small primary check (batch=8): exercises lane-padding 8 -> 128.
    x = jax.random.normal(kx, (8, input_dim), jnp.float32)
    out = jax.block_until_ready(fwd(x))
    ref = reference_forward(x, weights, biases, relu_flags)
    assert out.shape == (8, input_dim)
    assert jnp.allclose(out, ref, atol=1e-2, rtol=1e-2), "mismatch vs. reference (B=8)"

    # Secondary check: batch not a tile multiple, >1 grid steps (pipelined path).
    key, kx2 = jax.random.split(key)
    x2 = jax.random.normal(kx2, (200, input_dim), jnp.float32)
    out2 = jax.block_until_ready(
        autoencoder_forward(x2, weights, biases, relu_flags, max_tb=128))
    ref2 = reference_forward(x2, weights, biases, relu_flags)
    assert out2.shape == (200, input_dim)
    assert jnp.allclose(out2, ref2, atol=1e-2, rtol=1e-2), "mismatch vs. reference (B=200)"

    # TODO(synk): training utilities (MSELoss / Adam `learn` loop) are not part
    # of the forward pass and are intentionally not implemented as kernels.
    print("KERNEL_OK")
</pallas_src>

<mosaic_0001>
module attributes {stable_mosaic.version = 11 : i64} {
  func.func @kernel(%arg0: i32, %arg1: memref<64x128xbf16, #tpu.memory_space<vmem>>, %arg2: memref<32x64xbf16, #tpu.memory_space<vmem>>, %arg3: memref<16x32xbf16, #tpu.memory_space<vmem>>, %arg4: memref<8x16xbf16, #tpu.memory_space<vmem>>, %arg5: memref<16x8xbf16, #tpu.memory_space<vmem>>, %arg6: memref<32x16xbf16, #tpu.memory_space<vmem>>, %arg7: memref<64x32xbf16, #tpu.memory_space<vmem>>, %arg8: memref<32x1xf32, #tpu.memory_space<vmem>>, %arg9: memref<16x1xf32, #tpu.memory_space<vmem>>, %arg10: memref<8x1xf32, #tpu.memory_space<vmem>>, %arg11: memref<16x1xf32, #tpu.memory_space<vmem>>, %arg12: memref<32x1xf32, #tpu.memory_space<vmem>>, %arg13: memref<64x1xf32, #tpu.memory_space<vmem>>, %arg14: memref<64x128xf32, #tpu.memory_space<vmem>>) attributes {dimension_semantics = [#tpu.dimension_semantics<parallel>], iteration_bounds = array<i64: 1>, scalar_prefetch = 0 : i64, scratch_operands = 0 : i64, tpu.core_type = #tpu.core_type<tc>, window_params = [{transform_indices = @transform_0, window_bounds = array<i64: 64, 128>}, {pipeline_mode = #tpu.pipeline_mode<synchronous>, transform_indices = @transform_1, window_bounds = array<i64: 32, 64>}, {pipeline_mode = #tpu.pipeline_mode<synchronous>, transform_indices = @transform_2, window_bounds = array<i64: 16, 32>}, {pipeline_mode = #tpu.pipeline_mode<synchronous>, transform_indices = @transform_3, window_bounds = array<i64: 8, 16>}, {pipeline_mode = #tpu.pipeline_mode<synchronous>, transform_indices = @transform_4, window_bounds = array<i64: 16, 8>}, {pipeline_mode = #tpu.pipeline_mode<synchronous>, transform_indices = @transform_5, window_bounds = array<i64: 32, 16>}, {pipeline_mode = #tpu.pipeline_mode<synchronous>, transform_indices = @transform_6, window_bounds = array<i64: 64, 32>}, {pipeline_mode = #tpu.pipeline_mode<synchronous>, transform_indices = @transform_7, window_bounds = array<i64: 32, 1>}, {pipeline_mode = #tpu.pipeline_mode<synchronous>, transform_indices = @transform_8, window_bounds = array<i64: 16, 1>}, {pipeline_mode = #tpu.pipeline_mode<synchronous>, transform_indices = @transform_9, window_bounds = array<i64: 8, 1>}, {pipeline_mode = #tpu.pipeline_mode<synchronous>, transform_indices = @transform_10, window_bounds = array<i64: 16, 1>}, {pipeline_mode = #tpu.pipeline_mode<synchronous>, transform_indices = @transform_11, window_bounds = array<i64: 32, 1>}, {pipeline_mode = #tpu.pipeline_mode<synchronous>, transform_indices = @transform_12, window_bounds = array<i64: 64, 1>}, {transform_indices = @transform_13, window_bounds = array<i64: 64, 128>}]} {
    %c0 = arith.constant 0 : index
    %c0_0 = arith.constant 0 : index
    %0 = vector.load %arg1[%c0, %c0_0] : memref<64x128xbf16, #tpu.memory_space<vmem>>, vector<64x128xbf16>
    %c0_1 = arith.constant 0 : index
    %c0_2 = arith.constant 0 : index
    %1 = vector.load %arg2[%c0_1, %c0_2] : memref<32x64xbf16, #tpu.memory_space<vmem>>, vector<32x64xbf16>
    %cst = arith.constant dense<0.000000e+00> : vector<32x128xf32>
    %2 = tpu.matmul %1, %0, %cst {dimension_numbers = #tpu.dot_dimension_numbers<[1], [0], [0], [1], [0, 0, 1, 1], [], []>} : vector<32x64xbf16>, vector<64x128xbf16>, vector<32x128xf32> -> vector<32x128xf32>
    %c0_3 = arith.constant 0 : index
    %c0_4 = arith.constant 0 : index
    %3 = vector.load %arg8[%c0_3, %c0_4] : memref<32x1xf32, #tpu.memory_space<vmem>>, vector<32x1xf32>
    %4 = vector.broadcast %3 : vector<32x1xf32> to vector<32x128xf32>
    %5 = arith.addf %2, %4 : vector<32x128xf32>
    %cst_5 = arith.constant 0.000000e+00 : f32
    %6 = vector.broadcast %cst_5 : f32 to vector<32x128xf32>
    %7 = arith.maximumf %5, %6 : vector<32x128xf32>
    %8 = arith.truncf %7 : vector<32x128xf32> to vector<32x128xbf16>
    %c0_6 = arith.constant 0 : index
    %c0_7 = arith.constant 0 : index
    %9 = vector.load %arg3[%c0_6, %c0_7] : memref<16x32xbf16, #tpu.memory_space<vmem>>, vector<16x32xbf16>
    %cst_8 = arith.constant dense<0.000000e+00> : vector<16x128xf32>
    %10 = tpu.matmul %9, %8, %cst_8 {dimension_numbers = #tpu.dot_dimension_numbers<[1], [0], [0], [1], [0, 0, 1, 1], [], []>} : vector<16x32xbf16>, vector<32x128xbf16>, vector<16x128xf32> -> vector<16x128xf32>
    %c0_9 = arith.constant 0 : index
    %c0_10 = arith.constant 0 : index
    %11 = vector.load %arg9[%c0_9, %c0_10] : memref<16x1xf32, #tpu.memory_space<vmem>>, vector<16x1xf32>
    %12 = vector.broadcast %11 : vector<16x1xf32> to vector<16x128xf32>
    %13 = arith.addf %10, %12 : vector<16x128xf32>
    %cst_11 = arith.constant 0.000000e+00 : f32
    %14 = vector.broadcast %cst_11 : f32 to vector<16x128xf32>
    %15 = arith.maximumf %13, %14 : vector<16x128xf32>
    %16 = arith.truncf %15 : vector<16x128xf32> to vector<16x128xbf16>
    %c0_12 = arith.constant 0 : index
    %c0_13 = arith.constant 0 : index
    %17 = vector.load %arg4[%c0_12, %c0_13] : memref<8x16xbf16, #tpu.memory_space<vmem>>, vector<8x16xbf16>
    %cst_14 = arith.constant dense<0.000000e+00> : vector<8x128xf32>
    %18 = tpu.matmul %17, %16, %cst_14 {dimension_numbers = #tpu.dot_dimension_numbers<[1], [0], [0], [1], [0, 0, 1, 1], [], []>} : vector<8x16xbf16>, vector<16x128xbf16>, vector<8x128xf32> -> vector<8x128xf32>
    %c0_15 = arith.constant 0 : index
    %c0_16 = arith.constant 0 : index
    %19 = vector.load %arg10[%c0_15, %c0_16] : memref<8x1xf32, #tpu.memory_space<vmem>>, vector<8x1xf32>
    %20 = vector.broadcast %19 : vector<8x1xf32> to vector<8x128xf32>
    %21 = arith.addf %18, %20 : vector<8x128xf32>
    %22 = arith.truncf %21 : vector<8x128xf32> to vector<8x128xbf16>
    %c0_17 = arith.constant 0 : index
    %c0_18 = arith.constant 0 : index
    %23 = vector.load %arg5[%c0_17, %c0_18] : memref<16x8xbf16, #tpu.memory_space<vmem>>, vector<16x8xbf16>
    %cst_19 = arith.constant dense<0.000000e+00> : vector<16x128xf32>
    %24 = tpu.matmul %23, %22, %cst_19 {dimension_numbers = #tpu.dot_dimension_numbers<[1], [0], [0], [1], [0, 0, 1, 1], [], []>} : vector<16x8xbf16>, vector<8x128xbf16>, vector<16x128xf32> -> vector<16x128xf32>
    %c0_20 = arith.constant 0 : index
    %c0_21 = arith.constant 0 : index
    %25 = vector.load %arg11[%c0_20, %c0_21] : memref<16x1xf32, #tpu.memory_space<vmem>>, vector<16x1xf32>
    %26 = vector.broadcast %25 : vector<16x1xf32> to vector<16x128xf32>
    %27 = arith.addf %24, %26 : vector<16x128xf32>
    %cst_22 = arith.constant 0.000000e+00 : f32
    %28 = vector.broadcast %cst_22 : f32 to vector<16x128xf32>
    %29 = arith.maximumf %27, %28 : vector<16x128xf32>
    %30 = arith.truncf %29 : vector<16x128xf32> to vector<16x128xbf16>
    %c0_23 = arith.constant 0 : index
    %c0_24 = arith.constant 0 : index
    %31 = vector.load %arg6[%c0_23, %c0_24] : memref<32x16xbf16, #tpu.memory_space<vmem>>, vector<32x16xbf16>
    %cst_25 = arith.constant dense<0.000000e+00> : vector<32x128xf32>
    %32 = tpu.matmul %31, %30, %cst_25 {dimension_numbers = #tpu.dot_dimension_numbers<[1], [0], [0], [1], [0, 0, 1, 1], [], []>} : vector<32x16xbf16>, vector<16x128xbf16>, vector<32x128xf32> -> vector<32x128xf32>
    %c0_26 = arith.constant 0 : index
    %c0_27 = arith.constant 0 : index
    %33 = vector.load %arg12[%c0_26, %c0_27] : memref<32x1xf32, #tpu.memory_space<vmem>>, vector<32x1xf32>
    %34 = vector.broadcast %33 : vector<32x1xf32> to vector<32x128xf32>
    %35 = arith.addf %32, %34 : vector<32x128xf32>
    %cst_28 = arith.constant 0.000000e+00 : f32
    %36 = vector.broadcast %cst_28 : f32 to vector<32x128xf32>
    %37 = arith.maximumf %35, %36 : vector<32x128xf32>
    %38 = arith.truncf %37 : vector<32x128xf32> to vector<32x128xbf16>
    %c0_29 = arith.constant 0 : index
    %c0_30 = arith.constant 0 : index
    %39 = vector.load %arg7[%c0_29, %c0_30] : memref<64x32xbf16, #tpu.memory_space<vmem>>, vector<64x32xbf16>
    %cst_31 = arith.constant dense<0.000000e+00> : vector<64x128xf32>
    %40 = tpu.matmul %39, %38, %cst_31 {dimension_numbers = #tpu.dot_dimension_numbers<[1], [0], [0], [1], [0, 0, 1, 1], [], []>} : vector<64x32xbf16>, vector<32x128xbf16>, vector<64x128xf32> -> vector<64x128xf32>
    %c0_32 = arith.constant 0 : index
    %c0_33 = arith.constant 0 : index
    %41 = vector.load %arg13[%c0_32, %c0_33] : memref<64x1xf32, #tpu.memory_space<vmem>>, vector<64x1xf32>
    %42 = vector.broadcast %41 : vector<64x1xf32> to vector<64x128xf32>
    %43 = arith.addf %40, %42 : vector<64x128xf32>
    %c0_34 = arith.constant 0 : index
    %c0_35 = arith.constant 0 : index
    %44 = vector.load %arg14[%c0_34, %c0_35] : memref<64x128xf32, #tpu.memory_space<vmem>>, vector<64x128xf32>
    tpu.vector_store %arg14[%c0_34, %c0_35], %43 {strides = array<i32>} : memref<64x128xf32, #tpu.memory_space<vmem>>, vector<64x128xf32>,
    return
  }
  func.func @transform_0(%arg0: i32) -> (i32, i32) {
    %c0_i32 = arith.constant 0 : i32
    %c0_i32_0 = arith.constant 0 : i32
    return %c0_i32, %arg0 : i32, i32
  }
  func.func @transform_1(%arg0: i32) -> (i32, i32) {
    %c0_i32 = arith.constant 0 : i32
    %c0_i32_0 = arith.constant 0 : i32
    %c0_i32_1 = arith.constant 0 : i32
    return %c0_i32, %c0_i32_0 : i32, i32
  }
  func.func @transform_2(%arg0: i32) -> (i32, i32) {
    %c0_i32 = arith.constant 0 : i32
    %c0_i32_0 = arith.constant 0 : i32
    %c0_i32_1 = arith.constant 0 : i32
    return %c0_i32, %c0_i32_0 : i32, i32
  }
  func.func @transform_3(%arg0: i32) -> (i32, i32) {
    %c0_i32 = arith.constant 0 : i32
    %c0_i32_0 = arith.constant 0 : i32
    %c0_i32_1 = arith.constant 0 : i32
    return %c0_i32, %c0_i32_0 : i32, i32
  }
  func.func @transform_4(%arg0: i32) -> (i32, i32) {
    %c0_i32 = arith.constant 0 : i32
    %c0_i32_0 = arith.constant 0 : i32
    %c0_i32_1 = arith.constant 0 : i32
    return %c0_i32, %c0_i32_0 : i32, i32
  }
  func.func @transform_5(%arg0: i32) -> (i32, i32) {
    %c0_i32 = arith.constant 0 : i32
    %c0_i32_0 = arith.constant 0 : i32
    %c0_i32_1 = arith.constant 0 : i32
    return %c0_i32, %c0_i32_0 : i32, i32
  }
  func.func @transform_6(%arg0: i32) -> (i32, i32) {
    %c0_i32 = arith.constant 0 : i32
    %c0_i32_0 = arith.constant 0 : i32
    %c0_i32_1 = arith.constant 0 : i32
    return %c0_i32, %c0_i32_0 : i32, i32
  }
  func.func @transform_7(%arg0: i32) -> (i32, i32) {
    %c0_i32 = arith.constant 0 : i32
    %c0_i32_0 = arith.constant 0 : i32
    %c0_i32_1 = arith.constant 0 : i32
    return %c0_i32, %c0_i32_0 : i32, i32
  }
  func.func @transform_8(%arg0: i32) -> (i32, i32) {
    %c0_i32 = arith.constant 0 : i32
    %c0_i32_0 = arith.constant 0 : i32
    %c0_i32_1 = arith.constant 0 : i32
    return %c0_i32, %c0_i32_0 : i32, i32
  }
  func.func @transform_9(%arg0: i32) -> (i32, i32) {
    %c0_i32 = arith.constant 0 : i32
    %c0_i32_0 = arith.constant 0 : i32
    %c0_i32_1 = arith.constant 0 : i32
    return %c0_i32, %c0_i32_0 : i32, i32
  }
  func.func @transform_10(%arg0: i32) -> (i32, i32) {
    %c0_i32 = arith.constant 0 : i32
    %c0_i32_0 = arith.constant 0 : i32
    %c0_i32_1 = arith.constant 0 : i32
    return %c0_i32, %c0_i32_0 : i32, i32
  }
  func.func @transform_11(%arg0: i32) -> (i32, i32) {
    %c0_i32 = arith.constant 0 : i32
    %c0_i32_0 = arith.constant 0 : i32
    %c0_i32_1 = arith.constant 0 : i32
    return %c0_i32, %c0_i32_0 : i32, i32
  }
  func.func @transform_12(%arg0: i32) -> (i32, i32) {
    %c0_i32 = arith.constant 0 : i32
    %c0_i32_0 = arith.constant 0 : i32
    %c0_i32_1 = arith.constant 0 : i32
    return %c0_i32, %c0_i32_0 : i32, i32
  }
  func.func @transform_13(%arg0: i32) -> (i32, i32) {
    %c0_i32 = arith.constant 0 : i32
    %c0_i32_0 = arith.constant 0 : i32
    return %c0_i32, %arg0 : i32, i32
  }
}

</mosaic_0001>

<bundles_post_ra>
// kernel: autoencoder_forward.1
= control target key start
LH: loop header
LB: loop body
LE: loop exit
PB: predicated region body
PF: predicated region fallthrough
CT: control target
= control target key end

     0   :  { %18 = vsyncpa [#allocation3], 0  ;;  %s1201_s0 = inlined_call_operand.vmem [shape: bf16[64,128], index: 0, kind: input, shape index: {}]   ;;  %s1202_s1 = inlined_call_operand.vmem [shape: bf16[32,64], index: 1, kind: input, shape index: {}]   ;;  %s1203_s2 = inlined_call_operand.vmem [shape: bf16[16,32], index: 2, kind: input, shape index: {}]   ;;  %s1204_s3 = inlined_call_operand.hbm [shape: bf16[8,16], index: 3, kind: input, shape index: {}]   ;;  %s1205_s4 = inlined_call_operand.vmem [shape: bf16[16,8], index: 4, kind: input, shape index: {}]   ;;  %s1206_s5 = inlined_call_operand.vmem [shape: bf16[32,16], index: 5, kind: input, shape index: {}]   ;;  %s1207_s6 = inlined_call_operand.vmem [shape: bf16[64,32], index: 6, kind: input, shape index: {}]   ;;  %s1208_s7 = inlined_call_operand.hbm [shape: f32[32,1], index: 7, kind: input, shape index: {}]   ;;  %s1209_s8 = inlined_call_operand.hbm [shape: f32[16,1], index: 8, kind: input, shape index: {}]   ;;  %s1210_s9 = inlined_call_operand.hbm [shape: f32[8,1], index: 9, kind: input, shape index: {}]   ;;  %s1211_s10 = inlined_call_operand.hbm [shape: f32[16,1], index: 10, kind: input, shape index: {}]   ;;  %s1212_s11 = inlined_call_operand.vmem [shape: f32[32,1], index: 11, kind: input, shape index: {}]   ;;  %s1213_s12 = inlined_call_operand.vmem [shape: f32[64,1], index: 12, kind: input, shape index: {}]   ;;  %s1214_s13 = inlined_call_operand.vmem [shape: f32[64,128], index: 13, kind: output, shape index: {}]  }
   0x1   :  { %19 = vsyncpa [#allocation5], 0 }
   0x2   :  { %20 = vsyncpa [#allocation8], 0  ;;  %s937_s25 = smov [#allocation4]   ;;  %s821_s29 = scalar_lea.hbm %s1208_s7, 512 }
   0x3   :  { %s48_s26 = sshll.u32 %s937_s25, 4  ;;  %p822_p0 = scmp.ne.s32.totalorder %s1208_s7, %s821_s29  ;;  %s49_s26 = int_to_ptr.vmem [resolvable:$true] %s48_s26 }
   0x4   :  { %p825_p1 = scmp.lt.u32.totalorder %s821_s29, %s1208_s7 }
   0x6   :  { %p827_p2 = pnand %p825_p1, %p822_p0 }
   0x8   :  { %830 = shalt.err (!%p827_p2)
}
   0x9   :  { %s831_s17 = scalar_lea.vmem %s49_s26, 512  ;;  %p836_p4 = scmp.lt.s32.totalorder %s49_s26, %s49_s26 }
   0xa   :  { %p832_p3 = scmp.ne.s32.totalorder %s49_s26, %s831_s17  ;;  %p837_p5 = scmp.lt.s32.totalorder %s831_s17, %s831_s17 }
   0xc   :  { %p838_p6 = por %p837_p5, %p836_p4 }
   0xe   :  { %p839_p7 = pnand %p838_p6, %p832_p3 }
  0x10   :  { %842 = shalt.err (!%p839_p7)
}
  0x11   :  { %s938_s18 = smov 128   ;;  %s939_s19 = smov 8  }
  0x12   :  { %54 = dma.hbm_to_vmem [thread:$0]  %s1208_s7, 512, %s49_s26, [#allocation5], %s938_s18, %s938_s18, %s939_s19  }
  0x13   :  { %s940_s22 = smov [#allocation7]   ;;  %s941_s24 = smov [#allocation2]  }
  0x14   :  { %s73_s23 = sshll.u32 %s940_s22, 4  ;;  %s33_s25 = sshll.u32 %s941_s24, 4  ;;  %s74_s23 = int_to_ptr.vmem [resolvable:$true] %s73_s23  ;;  %s34_s25 = int_to_ptr.vmem [resolvable:$true] %s33_s25 }
  0x15   :  { %s843_s29 = scalar_lea.hbm %s1210_s9, 128 }
  0x16   :  { %p844_p8 = scmp.ne.s32.totalorder %s1210_s9, %s843_s29  ;;  %p847_p9 = scmp.lt.u32.totalorder %s843_s29, %s1210_s9 }
  0x18   :  { %p849_p10 = pnand %p847_p9, %p844_p8 }
  0x1a   :  { %852 = shalt.err (!%p849_p10)
}
  0x1b   :  { %s853_s7 = scalar_lea.vmem %s74_s23, 128  ;;  %p858_p12 = scmp.lt.s32.totalorder %s74_s23, %s74_s23 }
  0x1c   :  { %p854_p11 = scmp.ne.s32.totalorder %s74_s23, %s853_s7  ;;  %p859_p13 = scmp.lt.s32.totalorder %s853_s7, %s853_s7 }
  0x1e   :  { %p860_p0 = por %p859_p13, %p858_p12 }
  0x20   :  { %p861_p1 = pnand %p860_p0, %p854_p11 }
  0x22   :  { %864 = shalt.err (!%p861_p1)
}
  0x23   :  { %76 = dma.hbm_to_vmem [thread:$0]  %s1210_s9, 128, %s74_s23, [#allocation8]  }
  0x24   :  { %s865_s22 = scalar_lea.hbm %s1204_s3, 64 }
  0x25   :  { %p866_p2 = scmp.ne.s32.totalorder %s1204_s3, %s865_s22  ;;  %p869_p3 = scmp.lt.u32.totalorder %s865_s22, %s1204_s3 }
  0x27   :  { %p871_p4 = pnand %p869_p3, %p866_p2 }
  0x29   :  { %874 = shalt.err (!%p871_p4)
}
  0x2a   :  { %s875_s30 = scalar_lea.vmem %s34_s25, 64  ;;  %p880_p6 = scmp.lt.s32.totalorder %s34_s25, %s34_s25 }
  0x2b   :  { %p876_p5 = scmp.ne.s32.totalorder %s34_s25, %s875_s30  ;;  %p881_p7 = scmp.lt.s32.totalorder %s875_s30, %s875_s30 }
  0x2d   :  { %p882_p8 = por %p881_p7, %p880_p6 }
  0x2f   :  { %p883_p9 = pnand %p882_p8, %p876_p5 }
  0x31   :  { %886 = shalt.err (!%p883_p9)
}
  0x32   :  { %36 = dma.hbm_to_vmem [thread:$0]  %s1204_s3, 64, %s34_s25, [#allocation3]  }
  0x33   :  { %s942_s14 = smov [#allocation6]   ;;  %s943_s16 = smov [#allocation9]  }
  0x34   :  { %s60_s15 = sshll.u32 %s942_s14, 4  ;;  %s82_s7 = sshll.u32 %s943_s16, 4  ;;  %s61_s15 = int_to_ptr.vmem [resolvable:$true] %s60_s15  ;;  %s83_s7 = int_to_ptr.vmem [resolvable:$true] %s82_s7 }
  0x35   :  { %s887_s20 = scalar_lea.hbm %s1209_s8, 256 }
  0x36   :  { %p888_p10 = scmp.ne.s32.totalorder %s1209_s8, %s887_s20  ;;  %p891_p11 = scmp.lt.u32.totalorder %s887_s20, %s1209_s8 }
  0x38   :  { %p893_p12 = pnand %p891_p11, %p888_p10 }
  0x3a   :  { %896 = shalt.err (!%p893_p12)
}
  0x3b   :  { %s897_s3 = scalar_lea.vmem %s61_s15, 256  ;;  %p902_p0 = scmp.lt.s32.totalorder %s61_s15, %s61_s15 }
  0x3c   :  { %p898_p13 = scmp.ne.s32.totalorder %s61_s15, %s897_s3  ;;  %p903_p1 = scmp.lt.s32.totalorder %s897_s3, %s897_s3 }
  0x3e   :  { %p904_p2 = por %p903_p1, %p902_p0 }
  0x40   :  { %p905_p3 = pnand %p904_p2, %p898_p13 }
  0x42   :  { %908 = shalt.err (!%p905_p3)
}
  0x43   :  { %66 = dma.hbm_to_vmem [thread:$0]  %s1209_s8, 256, %s61_s15, [#allocation5], %s938_s18, %s938_s18, %s939_s19  }
  0x44   :  { %s909_s9 = scalar_lea.hbm %s1211_s10, 256 }
  0x45   :  { %p910_p4 = scmp.ne.s32.totalorder %s1211_s10, %s909_s9  ;;  %p913_p5 = scmp.lt.u32.totalorder %s909_s9, %s1211_s10 }
  0x47   :  { %p915_p6 = pnand %p913_p5, %p910_p4 }
  0x49   :  { %918 = shalt.err (!%p915_p6)
}
  0x4a   :  { %s919_s17 = scalar_lea.vmem %s83_s7, 256  ;;  %p924_p8 = scmp.lt.s32.totalorder %s83_s7, %s83_s7 }
  0x4b   :  { %p920_p7 = scmp.ne.s32.totalorder %s83_s7, %s919_s17  ;;  %p925_p9 = scmp.lt.s32.totalorder %s919_s17, %s919_s17 }
  0x4d   :  { %p926_p10 = por %p925_p9, %p924_p8 }
  0x4f   :  { %p927_p11 = pnand %p926_p10, %p920_p7 }
  0x51   :  { %930 = shalt.err (!%p927_p11)
}
  0x52   :  { %88 = dma.hbm_to_vmem [thread:$0]  %s1211_s10, 256, %s83_s7, [#allocation8], %s938_s18, %s938_s18, %s939_s19  }
  0x53   :  { %931 = dma.done.wait [#allocation3], 64  }
  0x54   :  { %932 = vsyncadd [#allocation3], 4294967232 }
  0x55   :  { %933 = dma.done.wait [#allocation5], 768  }
  0x56   :  { %934 = vsyncadd [#allocation5], 4294966528 }
  0x57   :  { %935 = dma.done.wait [#allocation8], 384  }
  0x58   :  { %936 = vsyncadd [#allocation8], 4294966912  ;;  %v944_v0 = vmov 0   ;;  %v807_v1 = vld [vmem:[%s1201_s0] sm:$0xff]   ;;  %v808_v2 = vld [vmem:[%s1201_s0 + $0x8] sm:$0xff]   ;;  %vm179_vm0 = vcmask 523264  }
  0x59   :  { %805 = vset.pattern.permute.xlu0 %v944_v0  ;;  %806 = vset.pattern.permute.xlu1 %v944_v0  ;;  %v809_v3 = vld [vmem:[%s1201_s0 + $0x10] sm:$0xff]   ;;  %v811_v4 = vld [vmem:[%s1202_s1] sm:$0xff]   ;;  %v810_v7 = vld [vmem:[%s1201_s0 + $0x18] sm:$0xff]   ;;  %v945_v28 = vmov 0.0   ;;  %vm946_vm1 = vmmov 0   ;;  %vm260_vm2 = vcmask 261120  }
  0x5a   :  { %745 = vmatprep.subr.bf16.mxu0 %v807_v1  ;;  %753 = vmatprep.mubr.msk.bf16.mxu0 %vm179_vm0, %v811_v4  ;;  %v121_v5 = vld [vmem:[#allocation4] sm:$0xff]  ;;  %v123_v6 = vld [vmem:[#allocation4 + $0x10] sm:$0xff]  ;;  %v122_v8 = vld [vmem:[#allocation4 + $0x8] sm:$0xff]  ;;  %vm315_vm3 = vcmask 130048   ;;  %vm383_vm4 = vcmask 1043456   ;;  %vm379_vm5 = vcmask 64512  }
  0x5b   :  { %746 = vmatpush3.bf16.msra.mxu0 %v807_v1  ;;  %127 = vperm.xlu0 %805, %v121_v5   ;;  %v124_v9 = vld [vmem:[#allocation4 + $0x18] sm:$0xff]  ;;  %v812_v10 = vld [vmem:[%s1202_s1 + $0x8] sm:$0xff]   ;;  %v309_v13 = vld [vmem:[#allocation7] sm:$0xff] }
  0x5c   :  { %747 = vmatprep.subr.bf16.mxu0 %v808_v2  ;;  %137 = vperm.xlu1 %806, %v123_v6   ;;  %v243_v11 = vld [vmem:[#allocation6] sm:$0xff]  ;;  %v244_v12 = vld [vmem:[#allocation6 + $0x8] sm:$0xff]  ;;  %v362_v14 = vld [vmem:[#allocation9] sm:$0xff] }
  0x5d   :  { %v363_v15 = vld [vmem:[#allocation9 + $0x8] sm:$0xff]  ;;  %v437_v18 = vld [vmem:[%s1212_s11 + $0x10] sm:$0xff]  ;;  %v438_v19 = vld [vmem:[%s1212_s11 + $0x18] sm:$0xff]  ;;  %757 = vmatprep.subr.bf16.mxu1 %v945_v28  ;;  %761 = vmatprep.mubr.msk.bf16.mxu1 %vm946_vm1, %v945_v28 }
  0x5e   :  { %v435_v16 = vld [vmem:[%s1212_s11] sm:$0xff]  ;;  %v436_v17 = vld [vmem:[%s1212_s11 + $0x8] sm:$0xff]  ;;  %v540_v22 = vld [vmem:[%s1213_s12 + $0x10] sm:$0xff] }
  0x5f   :  { %748 = vmatpush3.bf16.msra.mxu0 %v808_v2  ;;  %132 = vperm.xlu0 %805, %v122_v8   ;;  %v538_v20 = vld [vmem:[%s1213_s12] sm:$0xff]  ;;  %v539_v21 = vld [vmem:[%s1213_s12 + $0x8] sm:$0xff]  ;;  %v541_v23 = vld [vmem:[%s1213_s12 + $0x18] sm:$0xff] }
  0x60   :  { %749 = vmatprep.subr.bf16.mxu0 %v809_v3  ;;  %142 = vperm.xlu1 %806, %v124_v9   ;;  %v542_v24 = vld [vmem:[%s1213_s12 + $0x20] sm:$0xff]  ;;  %v543_v25 = vld [vmem:[%s1213_s12 + $0x28] sm:$0xff]  ;;  %v544_v26 = vld [vmem:[%s1213_s12 + $0x30] sm:$0xff] }
  0x61   :  { %v545_v27 = vld [vmem:[%s1213_s12 + $0x38] sm:$0xff]  ;;  %v813_v47 = vld [vmem:[%s1203_s2] sm:$0xff]  }
  0x62   :  { %v308_v59 = vld [vmem:[#allocation2] sm:$0xf] }
  0x63   :  { %750 = vmatpush3.bf16.msra.mxu0 %v809_v3  ;;  %247 = vperm.xlu0 %805, %v243_v11   ;;  %v814_v4 = vld [vmem:[%s1205_s4] sm:$0xff]  }
  0x64   :  { %751 = vmatprep.subr.bf16.mxu0 %v810_v7  ;;  %252 = vperm.xlu1 %806, %v244_v12   ;;  %v815_v5 = vld [vmem:[%s1206_s5] sm:$0xff]  }
  0x67   :  { %752 = vmatpush3.bf16.msra.mxu0 %v810_v7  ;;  %312 = vperm.xlu0 %805, %v309_v13  }
  0x68   :  { %366 = vperm.xlu1 %806, %v362_v14  }
  0x6a   :  { %754 = vmatmul.mubr.msk.bf16.vlgmr.msra.gmra.mrb[0].mxu0 %vm179_vm0, %v812_v10 }
  0x6b   :  { %371 = vperm.xlu0 %805, %v363_v15  }
  0x6c   :  { %441 = vperm.xlu1 %806, %v435_v16  }
  0x6f   :  { %446 = vperm.xlu0 %805, %v436_v17   ;;  %v816_v17 = vld [vmem:[%s1206_s5 + $0x8] sm:$0xff]  }
  0x70   :  { %451 = vperm.xlu1 %806, %v437_v18   ;;  %v817_v18 = vld [vmem:[%s1207_s6] sm:$0xff]  }
  0x71   :  { %787 = vmatprep.mubr.msk.bf16.mxu0 %vm260_vm2, %v817_v18 }
  0x73   :  { %456 = vperm.xlu0 %805, %v438_v19  }
  0x74   :  { %548 = vperm.xlu1 %806, %v538_v20  }
  0x77   :  { %553 = vperm.xlu0 %805, %v539_v21  }
  0x78   :  { %558 = vperm.xlu1 %806, %v540_v22  }
  0x7b   :  { %563 = vperm.xlu0 %805, %v541_v23  }
  0x7c   :  { %568 = vperm.xlu1 %806, %v542_v24  }
  0x7f   :  { %573 = vperm.xlu0 %805, %v543_v25  }
  0x80   :  { %578 = vperm.xlu1 %806, %v544_v26  }
  0x83   :  { %583 = vperm.xlu0 %805, %v545_v27  }
  0xda   :  { %v128_v30 = vpop.permute.xlu0 %127 }
  0xdb   :  { %v138_v29 = vpop.permute.xlu1 %137 }
  0xde   :  { %v133_v37 = vpop.permute.xlu0 %132 }
  0xdf   :  { %v143_v34 = vpop.permute.xlu1 %142 }
  0xe2   :  { %v248_v48 = vpop.permute.xlu0 %247 }
  0xe3   :  { %v253_v52 = vpop.permute.xlu1 %252 }
  0xe6   :  { %v313_v60 = vpop.permute.xlu0 %312 }
  0xe7   :  { %v367_v6 = vpop.permute.xlu1 %366 }
  0xea   :  { %v372_v10 = vpop.permute.xlu0 %371 }
  0xeb   :  { %v442_v19 = vpop.permute.xlu1 %441 }
  0xee   :  { %v447_v20 = vpop.permute.xlu0 %446 }
  0xef   :  { %v452_v21 = vpop.permute.xlu1 %451 }
  0xf2   :  { %v457_v25 = vpop.permute.xlu0 %456 }
 0x13d   :  { %v755_v31 = vpop.f32.mrb[0].mxu0 }
 0x13e   :  { %v229_v32 = vadd.f32 %v755_v31, %v138_v29  ;;  %v220_v33 = vpop.f32.mrb[1].mxu0 }
 0x13f   :  { %v221_v35 = vadd.f32 %v220_v33, %v128_v30  ;;  %v756_v36 = vpop.f32.mrb[2].mxu0 }
 0x140   :  { %v232_v38 = vadd.f32 %v756_v36, %v143_v34  ;;  %v223_v39 = vpop.f32.mrb[3].mxu0  ;;  %v237_v41 = vmax.f32 %v229_v32, 0.0 }
 0x141   :  { %v224_v40 = vadd.f32 %v223_v39, %v133_v37  ;;  %v235_v43 = vmax.f32 %v221_v35, 0.0  ;;  %v818_v37 = vld [vmem:[%s1207_s6 + $0x8] sm:$0xff]   ;;  %v820_v39 = vld [vmem:[%s1207_s6 + $0x18] sm:$0xff]  }
 0x142   :  { %v238_v42 = vmax.f32 %v232_v38, 0.0  ;;  %v819_v38 = vld [vmem:[%s1207_s6 + $0x10] sm:$0xff]  }
 0x143   :  { %v236_v44 = vmax.f32 %v224_v40, 0.0  ;;  %v549_v40 = vpop.permute.xlu1 %548 }
 0x144   :  { %v240_v45 = vpack.c.bf16 %v238_v42, %v237_v41  ;;  %v554_v41 = vpop.permute.xlu0 %553 }
 0x145   :  { %v239_v46 = vpack.c.bf16 %v236_v44, %v235_v43 }
 0x147   :  { %758 = vmatpush3.bf16.msra.mxu1 %v239_v46  ;;  %v559_v42 = vpop.permute.xlu1 %558 }
 0x148   :  { %759 = vmatprep.subr.bf16.mxu1 %v945_v28  ;;  %v564_v43 = vpop.permute.xlu0 %563 }
 0x14b   :  { %760 = vmatpush3.bf16.msra.mxu1 %v240_v45 }
 0x14c   :  { %765 = vmatprep.subr.bf16.mxu1 %v945_v28 }
 0x14e   :  { %762 = vmatmul.mubr.msk.bf16.vlgmr.msra.gmra.mrb[0].mxu1 %vm260_vm2, %v813_v47  ;;  %v569_v47 = vpop.permute.xlu1 %568 }
 0x14f   :  { %767 = vmatprep.mubr.msk.bf16.mxu1 %vm946_vm1, %v945_v28 }
 0x221   :  { %v298_v49 = vpop.f32.mrb[0].mxu1 }
 0x222   :  { %v299_v50 = vadd.f32 %v298_v49, %v248_v48  ;;  %v763_v51 = vpop.f32.mrb[1].mxu1 }
 0x223   :  { %v301_v53 = vpop.f32.mrb[2].mxu1 }
 0x224   :  { %v302_v54 = vadd.f32 %v301_v53, %v253_v52  ;;  %v764_v55 = vpop.f32.mrb[3].mxu1  ;;  %v305_v56 = vmax.f32 %v299_v50, 0.0  ;;  %v574_v52 = vpop.permute.xlu0 %573 }
 0x226   :  { %v306_v57 = vmax.f32 %v302_v54, 0.0  ;;  %v579_v54 = vpop.permute.xlu1 %578 }
 0x228   :  { %v307_v58 = vpack.c.bf16 %v306_v57, %v305_v56 }
 0x22a   :  { %766 = vmatpush3.bf16.msra.mxu1 %v307_v58  ;;  %v584_v58 = vpop.permute.xlu0 %583 }
 0x22b   :  { %771 = vmatprep.subr.bf16.mxu1 %v945_v28 }
 0x22d   :  { %768 = vmatmul.mubr.msk.bf16.vlgmr.msra.gmra.mrb[4].mxu1 %vm315_vm3, %v308_v59 }
 0x22e   :  { %773 = vmatprep.mubr.msk.bf16.mxu1 %vm946_vm1, %v945_v28 }
 0x300   :  { %v353_v61 = vpop.f32.mrb[4].mxu1 }
 0x301   :  { %v354_v62 = vadd.f32 %v353_v61, %v313_v60  ;;  %v769_v63 = vpop.f32.mrb[5].mxu1 }
 0x302   :  { %v356_v0 = vpop.f32.mrb[6].mxu1 }
 0x303   :  { %v359_v1 = vpack.c.bf16 %v354_v62, %v354_v62  ;;  %v770_v2 = vpop.f32.mrb[7].mxu1 }
 0x305   :  { %v385_v3 = vsel %vm383_vm4, %v359_v1, 0 }
 0x306   :  { %772 = vmatpush3.bf16.msra.mxu1 %v385_v3 }
 0x309   :  { %774 = vmatmul.mubr.msk.bf16.vlgmr.msra.gmra.mrb[8].mxu1 %vm379_vm5, %v814_v4 }
 0x30a   :  { %779 = vmatprep.mubr.msk.bf16.mxu1 %vm315_vm3, %v815_v5 }
 0x3dc   :  { %v421_v7 = vpop.f32.mrb[8].mxu1 }
 0x3dd   :  { %v422_v8 = vadd.f32 %v421_v7, %v367_v6  ;;  %v775_v9 = vpop.f32.mrb[9].mxu1 }
 0x3de   :  { %v424_v11 = vpop.f32.mrb[10].mxu1 }
 0x3df   :  { %v425_v12 = vadd.f32 %v424_v11, %v372_v10  ;;  %v776_v13 = vpop.f32.mrb[11].mxu1  ;;  %v428_v14 = vmax.f32 %v422_v8, 0.0 }
 0x3e1   :  { %v429_v15 = vmax.f32 %v425_v12, 0.0 }
 0x3e3   :  { %v430_v16 = vpack.c.bf16 %v429_v15, %v428_v14 }
 0x3e5   :  { %777 = vmatprep.subr.bf16.mxu1 %v430_v16 }
 0x3e6   :  { %778 = vmatpush3.bf16.msra.mxu1 %v430_v16 }
 0x3e9   :  { %780 = vmatmul.mubr.msk.bf16.vlgmr.msra.gmra.mrb[12].mxu1 %vm315_vm3, %v816_v17 }
 0x4bc   :  { %v781_v22 = vpop.f32.mrb[12].mxu1 }
 0x4bd   :  { %v518_v23 = vadd.f32 %v781_v22, %v452_v21  ;;  %v509_v24 = vpop.f32.mrb[13].mxu1 }
 0x4be   :  { %v510_v26 = vadd.f32 %v509_v24, %v442_v19  ;;  %v782_v27 = vpop.f32.mrb[14].mxu1 }
 0x4bf   :  { %v521_v28 = vadd.f32 %v782_v27, %v457_v25  ;;  %v512_v29 = vpop.f32.mrb[15].mxu1  ;;  %v526_v31 = vmax.f32 %v518_v23, 0.0 }
 0x4c0   :  { %v513_v30 = vadd.f32 %v512_v29, %v447_v20  ;;  %v524_v33 = vmax.f32 %v510_v26, 0.0 }
 0x4c1   :  { %v527_v32 = vmax.f32 %v521_v28, 0.0 }
 0x4c2   :  { %v525_v34 = vmax.f32 %v513_v30, 0.0 }
 0x4c3   :  { %v529_v35 = vpack.c.bf16 %v527_v32, %v526_v31 }
 0x4c4   :  { %v528_v36 = vpack.c.bf16 %v525_v34, %v524_v33 }
 0x4c6   :  { %783 = vmatprep.subr.bf16.mxu0 %v528_v36 }
 0x4c7   :  { %784 = vmatpush3.bf16.msra.mxu0 %v528_v36 }
 0x4c8   :  { %785 = vmatprep.subr.bf16.mxu0 %v529_v35 }
 0x4cb   :  { %786 = vmatpush3.bf16.msra.mxu0 %v529_v35 }
 0x4ce   :  { %788 = vmatmul.mubr.msk.bf16.vlgmr.msra.gmra.mrb[4].mxu0 %vm260_vm2, %v818_v37 }
 0x4cf   :  { %791 = vmatprep.mubr.msk.bf16.mxu0 %vm260_vm2, %v819_v38 }
 0x4d6   :  { %792 = vmatmul.mubr.msk.bf16.gmra.mrb[8].mxu0 %vm260_vm2, %v820_v39 }
 0x5a1   :  { %v789_v44 = vpop.f32.mrb[4].mxu0 }
 0x5a2   :  { %v661_v45 = vadd.f32 %v789_v44, %v559_v42  ;;  %v652_v46 = vpop.f32.mrb[5].mxu0 }
 0x5a3   :  { %v653_v48 = vadd.f32 %v652_v46, %v549_v40  ;;  %v790_v49 = vpop.f32.mrb[6].mxu0 }
 0x5a4   :  { %685 = vst [vmem:[%s1214_s13 + $0x10] sm:$0xff] %v661_v45  ;;  %v664_v50 = vadd.f32 %v790_v49, %v564_v43  ;;  %v655_v51 = vpop.f32.mrb[7].mxu0 }
 0x5a5   :  { %683 = vst [vmem:[%s1214_s13] sm:$0xff] %v653_v48  ;;  %v656_v53 = vadd.f32 %v655_v51, %v554_v41 }
 0x5a6   :  { %686 = vst [vmem:[%s1214_s13 + $0x18] sm:$0xff] %v664_v50 }
 0x5a7   :  { %684 = vst [vmem:[%s1214_s13 + $0x8] sm:$0xff] %v656_v53 }
 0x5a9   :  { %v793_v55 = vpop.f32.mrb[8].mxu0 }
 0x5aa   :  { %v677_v56 = vadd.f32 %v793_v55, %v579_v54  ;;  %v668_v57 = vpop.f32.mrb[9].mxu0 }
 0x5ab   :  { %v669_v59 = vadd.f32 %v668_v57, %v569_v47  ;;  %v794_v60 = vpop.f32.mrb[10].mxu0 }
 0x5ac   :  { %689 = vst [vmem:[%s1214_s13 + $0x30] sm:$0xff] %v677_v56  ;;  %v680_v61 = vadd.f32 %v794_v60, %v584_v58  ;;  %v671_v62 = vpop.f32.mrb[11].mxu0 }
 0x5ad   :  { %687 = vst [vmem:[%s1214_s13 + $0x20] sm:$0xff] %v669_v59  ;;  %v672_v63 = vadd.f32 %v671_v62, %v574_v52 }
 0x5ae   :  { %690 = vst [vmem:[%s1214_s13 + $0x38] sm:$0xff] %v680_v61 }
 0x5af   :  { %688 = vst [vmem:[%s1214_s13 + $0x28] sm:$0xff] %v672_v63 }
 0x5b0   :  { %695 = vsyncpa [#allocation3], 1 }
 0x5b1   :  { %696 = vsyncpa [#allocation5], 1 }
 0x5b2   :  { %697 = vsyncpa [#allocation8], 1 }

</bundles_post_ra>
